<compile_context>
chip_gen: v7x
topology: tpu7x:2x2x1
jax: 0.10.0
libtpu: 0.0.40
codegen_flags: <defaults>
</compile_context>

<pallas_src>
import functools

import jax
import jax.numpy as jnp
from jax import lax
from jax.experimental import pallas as pl
from jax.experimental.pallas import tpu as pltpu


def _round_up(x, k):
    return ((x + k - 1) // k) * k


def _vmem_plan():
    """Generation-aware (vmem_limit_bytes, target bf16 x-block bytes)."""
    vmem_bytes = None
    try:
        vmem_bytes = pltpu.get_tpu_info().vmem_capacity_bytes
    except Exception:
        vmem_bytes = None
    if vmem_bytes is None:
        try:
            kind = jax.devices()[0].device_kind.lower()
            vmem_bytes = (64 << 20) if "v7" in kind else (128 << 20)
        except Exception:
            vmem_bytes = 64 << 20
    if vmem_bytes <= (64 << 20):
        # v7x-class: 64 MiB VMEM per TensorCore -> ~10 MiB x blocks, 48 MiB scoped limit.
        return 48 << 20, 10 << 20
    # v5e / v6e class: 128 MiB physical VMEM -> ~16 MiB x blocks, 96 MiB scoped limit.
    return 96 << 20, 16 << 20


def _attention_pool_kernel(x_ref, w_ref, b_ref, q_ref, o_ref, *, m_valid):
    # x_ref: (1, Bt, mp, Dp)  bf16  word embeddings of one sentence index, one batch tile
    # w_ref: (1, Dp, Qp)      bf16  THIS sentence's projection weight (DMA'd per step)
    # b_ref: (1, 1, Qp)       f32   this sentence's projection bias (zero-padded to Qp)
    # q_ref: (1, 1, Qp)       f32   this sentence's context/query vector, lane-dense
    # o_ref: (Bt, 1, 1, Dp)   f32   pooled sentence vectors, already in output layout
    x = x_ref[0]                               # (Bt, mp, Dp) bf16
    Bt, mp, Dp = x.shape
    w = w_ref[0]                               # (Dp, Qp) bf16
    b = b_ref[0]                               # (1, Qp)  f32
    q = q_ref[0]                               # (1, Qp)  f32

    # Projection: ONE flattened MXU matmul with f32 accumulation.  mp % 8 == 0 and
    # Dp % 128 == 0, so this reshape is a pure sublane merge (no relayout copy).
    x2 = x.reshape(Bt * mp, Dp)
    u = jnp.tanh(jnp.dot(x2, w, preferred_element_type=jnp.float32) + b)    # (Bt*mp, Qp) f32

    # Attention scores on the VPU/XLU: lane-dense multiply + lane reduce (no N=1 MXU pass).
    s = jnp.sum(u * q, axis=-1, keepdims=True)                              # (Bt*mp, 1) f32
    s = s.reshape(Bt, mp, 1)                                                # sublane split, free

    # Mask padded word slots: their embeddings are zero but tanh(b).q is not.
    if m_valid < mp:
        word_id = lax.broadcasted_iota(jnp.int32, (Bt, mp, 1), 1)
        s = jnp.where(word_id < m_valid, s, -1e30)

    # Numerically-stable softmax over the word (sublane) axis, all in f32.
    s = s - jnp.max(s, axis=1, keepdims=True)
    e = jnp.exp(s)
    denom = jnp.sum(e, axis=1, keepdims=True)
    # approx reciprocal (EUP slot): each row sums to 1 +- ~2^-12 — negligible here.
    alpha = e * pl.reciprocal(denom, approx=True)                           # (Bt, mp, 1) f32

    # Weighted sum over words: VPU broadcast-multiply (+ f32 promotion) + XLU sublane
    # reduce.  Keeps the MXU free and keeps alpha in f32.
    pooled = jnp.sum(alpha * x, axis=1, keepdims=True)                      # (Bt, 1, Dp) f32

    o_ref[:, 0, :, :] = pooled.astype(o_ref.dtype)


def section_attention_pallas(text_embed, w_all, b_all, q_all, *, b_tile=None):
    """text_embed: (n, B, m, D); w_all: (n, D, Q); b_all: (n, Q); q_all: (n, Q).
    Returns last_hidden_state of shape (B, n, 1, D), matching torch.stack([... (B,1,D) ...], dim=1)."""
    n, B, m, D = text_embed.shape
    Q = w_all.shape[-1]
    Dp = _round_up(D, 128)            # lane-dense embedding dim (zero pad is exact)
    Qp = _round_up(Q, 128)            # lane-dense query dim (zero pad is exact)
    mp = _round_up(m, 8)              # sublane-aligned word count (padded words are masked)

    # x streams as bf16.  Cast audit: the in-script encoder already emits bf16, so this
    # is a no-op; if a real upstream encoder materializes f32 in HBM, make it emit bf16
    # (or verify the cast fuses) — otherwise the extra round-trip adds ~50% HBM traffic.
    x = text_embed if text_embed.dtype == jnp.bfloat16 else text_embed.astype(jnp.bfloat16)

    vmem_limit, x_block_bytes = _vmem_plan()
    if b_tile is None:
        b_tile = max(1, min(B, x_block_bytes // (mp * Dp * 2)))
    n_b = pl.cdiv(B, b_tile)
    B_pad = n_b * b_tile              # padded last batch tile instead of a divisor search

    # Zero-pad activations / params; all pads are exact (zeros contribute nothing, padded
    # words are masked in the kernel, padded batch rows / Dp columns are sliced off below).
    x = jnp.pad(x, ((0, 0), (0, B_pad - B), (0, mp - m), (0, Dp - D)))
    w = jnp.pad(w_all, ((0, 0), (0, Dp - D), (0, Qp - Q))).astype(jnp.bfloat16)
    b = jnp.pad(b_all, ((0, 0), (0, Qp - Q))).astype(jnp.float32).reshape(n, 1, Qp)
    q = jnp.pad(q_all, ((0, 0), (0, Qp - Q))).astype(jnp.float32).reshape(n, 1, Qp)

    kernel = functools.partial(_attention_pool_kernel, m_valid=m)

    out = pl.pallas_call(
        kernel,
        out_shape=jax.ShapeDtypeStruct((B_pad, n, 1, Dp), jnp.float32),
        grid_spec=pltpu.PrefetchScalarGridSpec(
            num_scalar_prefetch=0,
            grid=(n_b, n),                    # (batch tiles, sentences) — both independent
            in_specs=[
                pl.BlockSpec((1, b_tile, mp, Dp), lambda bb, i: (i, bb, 0, 0)),
                # per-sentence params: small per-step DMA instead of all-n VMEM residency
                pl.BlockSpec((1, Dp, Qp), lambda bb, i: (i, 0, 0)),
                pl.BlockSpec((1, 1, Qp), lambda bb, i: (i, 0, 0)),
                pl.BlockSpec((1, 1, Qp), lambda bb, i: (i, 0, 0)),
            ],
            out_specs=pl.BlockSpec((b_tile, 1, 1, Dp), lambda bb, i: (bb, i, 0, 0)),
        ),
        compiler_params=pltpu.CompilerParams(
            dimension_semantics=("parallel", "parallel"),
            vmem_limit_bytes=vmem_limit),
    )(x, w, b, q)
    return out[:B, :, :, :D]                  # (B, n, 1, D) — final layout


def section_attention_ref(text_embed, w_all, b_all, q_all):
    """Pure-JAX f32 reference of the same math (for correctness check)."""
    x = text_embed.astype(jnp.float32)
    u = jnp.tanh(jnp.einsum("nbmd,ndq->nbmq", x, w_all) + b_all[:, None, None, :])
    scores = jnp.einsum("nbmq,nq->nbm", u, q_all)
    alpha = jax.nn.softmax(scores, axis=-1)
    pooled = jnp.einsum("nbm,nbmd->nbd", alpha, x)                    # (n, B, D)
    return jnp.transpose(pooled, (1, 0, 2))[:, :, None, :]            # (B, n, 1, D)


if __name__ == "__main__":
    # Small, forward-consistent shapes.
    B, n_sent, m_words = 2, 3, 8          # batch, max_sent, words per sentence
    D, Q = 32, 16                         # sequen_embedding_dim, query_dim
    vocab = 50

    key = jax.random.PRNGKey(0)
    k_ids, k_emb, k_w, k_b, k_q = jax.random.split(key, 5)

    # inputs_section: (B, n, m) token ids
    inputs_section = jax.random.randint(k_ids, (B, n_sent, m_words), 0, vocab, dtype=jnp.int32)

    # TODO(synk): the real `encoder` is an externally injected Transformer; it is modeled
    # here as a deterministic embedding lookup producing (B, m, D) per sentence.  The table
    # is bf16 so the encoder emits bf16 activations directly (no extra cast round-trip).
    emb_table = (jax.random.normal(k_emb, (vocab, D), dtype=jnp.float32) * 0.1).astype(jnp.bfloat16)

    # Per-sentence Attention parameters (one SentEmbedding/Attention per sentence index).
    w_all = jax.random.normal(k_w, (n_sent, D, Q), dtype=jnp.float32) * (1.0 / jnp.sqrt(D))
    b_all = jax.random.normal(k_b, (n_sent, Q), dtype=jnp.float32) * 0.01
    q_all = jax.random.normal(k_q, (n_sent, Q), dtype=jnp.float32) * (1.0 / jnp.sqrt(Q))

    # Glue: encoder pass (embedding lookup), then transpose(0,1) like the PyTorch code:
    # (B, n, m) -> (n, B, m) -> (n, B, m, D)   [bf16]
    text_embed = emb_table[jnp.transpose(inputs_section, (1, 0, 2))]

    out = section_attention_pallas(text_embed, w_all, b_all, q_all)
    out = jax.block_until_ready(out)

    # Reference on the same bf16-rounded activations (kernel streams x as bf16).
    x_bf16_f32 = text_embed.astype(jnp.float32)
    ref = section_attention_ref(x_bf16_f32, w_all, b_all, q_all)

    assert out.shape == (B, n_sent, 1, D), out.shape
    max_err = float(jnp.max(jnp.abs(out - ref)))
    assert jnp.allclose(out, ref, atol=2e-2, rtol=2e-2), max_err

    print("KERNEL_OK")
</pallas_src>

<mosaic_0001>
module attributes {stable_mosaic.version = 11 : i64} {
  func.func @_attention_pool_kernel(%arg0: i32, %arg1: i32, %arg2: memref<1x2x8x128xbf16, #tpu.memory_space<vmem>>, %arg3: memref<1x128x128xbf16, #tpu.memory_space<vmem>>, %arg4: memref<1x1x128xf32, #tpu.memory_space<vmem>>, %arg5: memref<1x1x128xf32, #tpu.memory_space<vmem>>, %arg6: memref<2x1x1x128xf32, #tpu.memory_space<vmem>>) attributes {dimension_semantics = [#tpu.dimension_semantics<parallel>, #tpu.dimension_semantics<parallel>], iteration_bounds = array<i64: 1, 3>, scalar_prefetch = 0 : i64, scratch_operands = 0 : i64, tpu.core_type = #tpu.core_type<tc>, window_params = [{transform_indices = @transform_0, window_bounds = array<i64: 1, 2, 8, 128>}, {transform_indices = @transform_1, window_bounds = array<i64: 1, 128, 128>}, {transform_indices = @transform_2, window_bounds = array<i64: 1, 1, 128>}, {transform_indices = @transform_3, window_bounds = array<i64: 1, 1, 128>}, {transform_indices = @transform_4, window_bounds = array<i64: 2, 1, 1, 128>}]} {
    %c0 = arith.constant 0 : index
    %c0_0 = arith.constant 0 : index
    %c0_1 = arith.constant 0 : index
    %c0_2 = arith.constant 0 : index
    %0 = vector.load %arg2[%c0, %c0_0, %c0_1, %c0_2] : memref<1x2x8x128xbf16, #tpu.memory_space<vmem>>, vector<1x2x8x128xbf16>
    %1 = vector.shape_cast %0 : vector<1x2x8x128xbf16> to vector<2x8x128xbf16>
    %c0_3 = arith.constant 0 : index
    %c0_4 = arith.constant 0 : index
    %c0_5 = arith.constant 0 : index
    %2 = vector.load %arg3[%c0_3, %c0_4, %c0_5] : memref<1x128x128xbf16, #tpu.memory_space<vmem>>, vector<1x128x128xbf16>
    %3 = vector.shape_cast %2 : vector<1x128x128xbf16> to vector<128x128xbf16>
    %c0_6 = arith.constant 0 : index
    %c0_7 = arith.constant 0 : index
    %c0_8 = arith.constant 0 : index
    %4 = vector.load %arg4[%c0_6, %c0_7, %c0_8] : memref<1x1x128xf32, #tpu.memory_space<vmem>>, vector<1x1x128xf32>
    %5 = vector.shape_cast %4 : vector<1x1x128xf32> to vector<1x128xf32>
    %c0_9 = arith.constant 0 : index
    %c0_10 = arith.constant 0 : index
    %c0_11 = arith.constant 0 : index
    %6 = vector.load %arg5[%c0_9, %c0_10, %c0_11] : memref<1x1x128xf32, #tpu.memory_space<vmem>>, vector<1x1x128xf32>
    %7 = vector.shape_cast %6 : vector<1x1x128xf32> to vector<1x128xf32>
    %8 = vector.shape_cast %1 : vector<2x8x128xbf16> to vector<16x128xbf16>
    %cst = arith.constant dense<0.000000e+00> : vector<16x128xf32>
    %9 = tpu.matmul %8, %3, %cst {dimension_numbers = #tpu.dot_dimension_numbers<[1], [0], [0], [1], [0, 0, 1, 1], [], []>} : vector<16x128xbf16>, vector<128x128xbf16>, vector<16x128xf32> -> vector<16x128xf32>
    %10 = vector.broadcast %5 : vector<1x128xf32> to vector<16x128xf32>
    %11 = arith.addf %9, %10 : vector<16x128xf32>
    %12 = math.tanh %11 : vector<16x128xf32>
    %13 = vector.broadcast %7 : vector<1x128xf32> to vector<16x128xf32>
    %14 = arith.mulf %12, %13 : vector<16x128xf32>
    %cst_12 = arith.constant dense<0.000000e+00> : vector<16xf32>
    %15 = vector.multi_reduction <add>, %14, %cst_12 [1] : vector<16x128xf32> to vector<16xf32>
    %16 = vector.shape_cast %15 : vector<16xf32> to vector<16x1xf32>
    %17 = vector.shape_cast %16 : vector<16x1xf32> to vector<2x8x1xf32>
    %cst_13 = arith.constant dense<0xFF800000> : vector<2x1xf32>
    %18 = vector.multi_reduction <maximumf>, %17, %cst_13 [1] : vector<2x8x1xf32> to vector<2x1xf32>
    %19 = vector.shape_cast %18 : vector<2x1xf32> to vector<2x1x1xf32>
    %20 = vector.broadcast %19 : vector<2x1x1xf32> to vector<2x8x1xf32>
    %21 = arith.subf %17, %20 : vector<2x8x1xf32>
    %22 = math.exp %21 : vector<2x8x1xf32>
    %cst_14 = arith.constant dense<0.000000e+00> : vector<2x1xf32>
    %23 = vector.multi_reduction <add>, %22, %cst_14 [1] : vector<2x8x1xf32> to vector<2x1xf32>
    %24 = vector.shape_cast %23 : vector<2x1xf32> to vector<2x1x1xf32>
    %25 = tpu.reciprocal %24 {approx = true} : vector<2x1x1xf32> -> vector<2x1x1xf32>
    %26 = vector.broadcast %25 : vector<2x1x1xf32> to vector<2x8x1xf32>
    %27 = arith.mulf %22, %26 : vector<2x8x1xf32>
    %28 = arith.extf %1 : vector<2x8x128xbf16> to vector<2x8x128xf32>
    %29 = vector.broadcast %27 : vector<2x8x1xf32> to vector<2x8x128xf32>
    %30 = arith.mulf %29, %28 : vector<2x8x128xf32>
    %cst_15 = arith.constant dense<0.000000e+00> : vector<2x128xf32>
    %31 = vector.multi_reduction <add>, %30, %cst_15 [1] : vector<2x8x128xf32> to vector<2x128xf32>
    %32 = vector.shape_cast %31 : vector<2x128xf32> to vector<2x1x128xf32>
    %c0_16 = arith.constant 0 : index
    %c0_17 = arith.constant 0 : index
    %c0_18 = arith.constant 0 : index
    %c0_19 = arith.constant 0 : index
    %33 = vector.load %arg6[%c0_16, %c0_17, %c0_18, %c0_19] : memref<2x1x1x128xf32, #tpu.memory_space<vmem>>, vector<2x1x1x128xf32>
    %34 = vector.shape_cast %33 : vector<2x1x1x128xf32> to vector<2x1x128xf32>
    %35 = vector.shape_cast %32 : vector<2x1x128xf32> to vector<2x1x1x128xf32>
    tpu.vector_store %arg6[%c0_16, %c0_17, %c0_18, %c0_19], %35 {strides = array<i32>} : memref<2x1x1x128xf32, #tpu.memory_space<vmem>>, vector<2x1x1x128xf32>,
    return
  }
  func.func @transform_0(%arg0: i32, %arg1: i32) -> (i32, i32, i32, i32) {
    %c0_i32 = arith.constant 0 : i32
    %c0_i32_0 = arith.constant 0 : i32
    %c0_i32_1 = arith.constant 0 : i32
    return %arg1, %arg0, %c0_i32, %c0_i32_0 : i32, i32, i32, i32
  }
  func.func @transform_1(%arg0: i32, %arg1: i32) -> (i32, i32, i32) {
    %c0_i32 = arith.constant 0 : i32
    %c0_i32_0 = arith.constant 0 : i32
    %c0_i32_1 = arith.constant 0 : i32
    return %arg1, %c0_i32, %c0_i32_0 : i32, i32, i32
  }
  func.func @transform_2(%arg0: i32, %arg1: i32) -> (i32, i32, i32) {
    %c0_i32 = arith.constant 0 : i32
    %c0_i32_0 = arith.constant 0 : i32
    %c0_i32_1 = arith.constant 0 : i32
    return %arg1, %c0_i32, %c0_i32_0 : i32, i32, i32
  }
  func.func @transform_3(%arg0: i32, %arg1: i32) -> (i32, i32, i32) {
    %c0_i32 = arith.constant 0 : i32
    %c0_i32_0 = arith.constant 0 : i32
    %c0_i32_1 = arith.constant 0 : i32
    return %arg1, %c0_i32, %c0_i32_0 : i32, i32, i32
  }
  func.func @transform_4(%arg0: i32, %arg1: i32) -> (i32, i32, i32, i32) {
    %c0_i32 = arith.constant 0 : i32
    %c0_i32_0 = arith.constant 0 : i32
    %c0_i32_1 = arith.constant 0 : i32
    return %arg0, %arg1, %c0_i32, %c0_i32_0 : i32, i32, i32, i32
  }
}

</mosaic_0001>

<bundles_post_ra>
// kernel: tpu_custom_call.1
= control target key start
LH: loop header
LB: loop body
LE: loop exit
PB: predicated region body
PF: predicated region fallthrough
CT: control target
= control target key end

     0   :  { %s1417_s0 = inlined_call_operand.hbm [shape: bf16[3,2,8,128], index: 0, kind: input, shape index: {}]   ;;  %s1418_s1 = inlined_call_operand.hbm [shape: bf16[3,128,128], index: 1, kind: input, shape index: {}]   ;;  %s1419_s2 = inlined_call_operand.hbm [shape: f32[3,1,128], index: 2, kind: input, shape index: {}]   ;;  %s1420_s3 = inlined_call_operand.hbm [shape: f32[3,1,128], index: 3, kind: input, shape index: {}]   ;;  %s1421_s4 = inlined_call_operand.hbm [shape: f32[2,3,1,128], index: 4, kind: output, shape index: {}]  }
   0x1   :  { %1429 = sst [smem:[#allocation17_spill]] %s1417_s0 }
   0x2   :  { %1430 = sst [smem:[#allocation18_spill]] %s1418_s1 }
   0x3   :  { %9 = vsyncpa [#allocation3], 0 }
   0x4   :  { %11 = vsyncpa [#allocation3 + $0x1], 0 }
   0x5   :  { %12 = vsyncpa [#allocation6], 0 }
   0x6   :  { %14 = vsyncpa [#allocation6 + $0x1], 0 }
   0x7   :  { %15 = vsyncpa [#allocation9], 0 }
   0x8   :  { %17 = vsyncpa [#allocation9 + $0x1], 0 }
   0x9   :  { %18 = vsyncpa [#allocation4], 0 }
   0xa   :  { %20 = vsyncpa [#allocation4 + $0x1], 0  ;;  %s1108_s15 = smov 0   ;;  %s1110_s16 = smov 0  }
   0xb   :  { %s1112_s17 = smov 0   ;;  %s1114_s18 = smov 0  }
   0xc   :  { %s1116_s19 = smov 0   ;;  %s1118_s20 = smov 0  }
   0xd LB: > { %s1139_s21 = sadd.s32 4294967295, %s1069_s20   ;;  %s692_s22 = sadd.s32 4294967294, %s1069_s20   ;;  %s1069_s20 = sphi %s1118_s20, %s26_s20   ;;  %s1065_s19 = sphi %s1116_s19, %s1455_s19   ;;  %s1061_s18 = sphi %s1114_s18, %s1454_s18   ;;  %s1057_s17 = sphi %s1112_s17, %s1453_s17   ;;  %s1053_s16 = sphi %s1110_s16, %s1452_s16   ;;  %s1049_s15 = sphi %s1108_s15, %s1451_s15  }
   0xe   : > { %s35_s23 = sadd.s32 1, %s1065_s19  ;;  %s47_s24 = sadd.s32 1, %s1057_s17 }
   0xf   : > { %p36_p0 = scmp.ge.s32.totalorder %s35_s23, 3  ;;  %p54_p1 = scmp.ne.s32.totalorder %s1057_s17, %s1053_s16 }
  0x10   : > { %p55_p2 = scmp.eq.s32.totalorder %s1069_s20, 0  ;;  %p60_p3 = scmp.ne.s32.totalorder %s1053_s16, %s1049_s15 }
  0x11   : > { %s1457_s23 = smov (%p36_p0, %s35_s23), 0  ;;  %p61_p5 = scmp.eq.s32.totalorder %s1139_s21, 0 }
  0x12   : > { %1431 = sst [smem:[#allocation15_spill]] %s1457_s23  ;;  %p56_p4 = por %p55_p2, %p54_p1 }
  0x13   : > { %s42_s25 = ssub.s32 %s1065_s19, %s1457_s23  ;;  %p164_p6 = scmp.eq.s32.totalorder %s1139_s21, 2 }
  0x14   : > { %p45_p7 = scmp.eq.s32.totalorder %s42_s25, 0  ;;  %p1155_p8 = por %p61_p5, %p60_p3 }
  0x15   : > { %p1159_p9 = por %p164_p6, %p54_p1  ;;  %p170_p10 = scmp.eq.s32.totalorder %s692_s22, 2 }
  0x16   : > { %s1432_s26 = scalar_select %p1155_p8, 1, 0 }
  0x17   : > { %s1433_s27 = scalar_select %p1159_p9, 1, 0 }
  0x18   : > { %s1164_s28 = scalar_select %p45_p7, %s1057_s17, %s47_s24  }
  0x19   : > { %p1166_p11 = por %p170_p10, %p60_p3  ;;  %p780_p12 = scmp.lt.s32.totalorder %s1069_s20, 3 }
  0x1a   : > { %1434 = sst [smem:[#allocation16_spill]] %s1164_s28  ;;  %s1172_s30 = sand.u32 1, %s1057_s17  }
  0x1b   : > { %s1435_s29 = scalar_select %p1166_p11, 1, 0 }
  0x1c   : > { %p1174_p13 = pnand %p780_p12, %p56_p4  ;;  %s213_s6 = sand.u32 1, %s1069_s20  }
  0x1d   : > { %s698_s7 = sshll.u32 %s1172_s30, 6  ;;  %s723_s8 = sshll.u32 %s1065_s19, 10 }
  0x1e   : > { %s1436_s5 = scalar_select %p1174_p13, 1, 0 }
  0x1f   : > { %s217_s9 = scalar_lea.vmem [#allocation5], %s698_s7  ;;  %s1437_s1 = sld [smem:[#allocation18_spill]] }
  0x20   : > { %s224_s10 = sshll.u32 %s217_s9, 4  ;;  %s1188_s14 = scalar_lea.sflag [#allocation6], %s213_s6  ;;  %s1186_s10 = int_to_ptr.vmem [resolvable:$true] %s224_s10 }
  0x21   : > { %p1194_p1 = pneg %p1174_p13 }
  0x25   : > { %s1184_s13 = scalar_lea.hbm %s1437_s1, %s723_s8  ;;  %s864_s8 = scalar_lea.hbm %s1437_s1, 3072 }
  0x26   : > { %s859_s22 = scalar_lea.hbm %s1184_s13, 1024  ;;  %p865_p4 = scmp.lt.u32.totalorder %s1184_s13, %s1437_s1 }
  0x27   : > { %p860_p0 = scmp.ne.s32.totalorder %s1184_s13, %s859_s22  ;;  %p866_p5 = scmp.lt.u32.totalorder %s864_s8, %s859_s22 }
  0x28   : > { %p868_p7 = scmp.lt.u32.totalorder %s859_s22, %s1184_s13 }
  0x29   : > { %p862_p2 = pnand %p1194_p1, %p860_p0  ;;  %p867_p6 = por %p866_p5, %p865_p4 }
  0x2b   : > { %p863_p3 = pneg %p862_p2  ;;  %p869_p10 = por %p868_p7, %p867_p6 }
  0x2d   : > { %p870_p12 = pnand %p869_p10, %p863_p3 }
  0x2f   : > { %873 = shalt.err (!%p870_p12)
}
  0x30   : > { %s874_s6 = scalar_lea.vmem %s1186_s10, 1024  ;;  %s1071_s12 = smov [#allocation5]  }
  0x31   : > { %p875_p0 = scmp.ne.s32.totalorder %s1186_s10, %s874_s6  ;;  %s879_s25 = sshll.u32 %s1071_s12, 4  ;;  %s880_s25 = int_to_ptr.vmem [resolvable:$false] %s879_s25 }
  0x32   : > { %s881_s7 = scalar_lea.vmem %s880_s25, 2048  ;;  %p882_p9 = scmp.lt.s32.totalorder %s1186_s10, %s880_s25 }
  0x33   : > { %p877_p2 = pnand %p875_p0, %p1194_p1  ;;  %p883_p8 = scmp.lt.s32.totalorder %s881_s7, %s874_s6 }
  0x35   : > { %p878_p11 = pneg %p877_p2  ;;  %p884_p4 = por %p883_p8, %p882_p9 }
  0x37   : > { %p885_p5 = pnand %p884_p4, %p878_p11 }
  0x39   : > { %888 = shalt.err (!%p885_p5)
}
  0x3a   : > { %s1425_s22 = smov 64   ;;  %s1426_s8 = smov 4  }
  0x3b   : > { %769 = dma.hbm_to_vmem [thread:$0]  (!%p1174_p13), %s1184_s13, 1024, %s1186_s10, %s1188_s14, %s1425_s22, %s1425_s22, %s1426_s8  }
  0x3c   : > { %p703_p8 = scmp.ge.s32.totalorder %s1069_s20, 1  ;;  %p266_p9 = scmp.lt.s32.totalorder %s1069_s20, 4 }
  0x3d   : > { %s695_s11 = sshll.u32 %s1172_s30, 3  ;;  %s722_s6 = sshll.u32 %s1065_s19, 7 }
  0x3e   : > { %p1223_p11 = pnand %p703_p8, %p266_p9  ;;  %s1440_s0 = sld [smem:[#allocation17_spill]] }
  0x3f   : > { %s194_s1 = scalar_lea.vmem [#allocation2], %s695_s11  ;;  %s701_s10 = sshll.u32 %s1065_s19, 4 }
  0x40   : > { %s1439_s9 = scalar_select %p1223_p11, 1, 0 }
  0x41   : > { %s203_s23 = sshll.u32 %s194_s1, 4  ;;  %s191_s13 = scalar_lea.sflag [#allocation3], %s1172_s30  ;;  %s1234_s23 = int_to_ptr.vmem [resolvable:$true] %s203_s23 }
  0x44   : > { %s1232_s7 = scalar_lea.hbm %s1440_s0, %s722_s6  ;;  %s894_s6 = scalar_lea.hbm %s1440_s0, 384 }
  0x45   : > { %s889_s22 = scalar_lea.hbm %s1232_s7, 128  ;;  %p895_p10 = scmp.lt.u32.totalorder %s1232_s7, %s1440_s0 }
  0x46   : > { %p890_p3 = scmp.ne.s32.totalorder %s1232_s7, %s889_s22  ;;  %p896_p12 = scmp.lt.u32.totalorder %s894_s6, %s889_s22 }
  0x47   : > { %p898_p2 = scmp.lt.u32.totalorder %s889_s22, %s1232_s7 }
  0x48   : > { %p892_p6 = pnand %p890_p3, %p1194_p1  ;;  %p897_p0 = por %p896_p12, %p895_p10 }
  0x4a   : > { %p893_p7 = pneg %p892_p6  ;;  %p899_p4 = por %p898_p2, %p897_p0 }
  0x4c   : > { %p900_p5 = pnand %p899_p4, %p893_p7 }
  0x4e   : > { %903 = shalt.err (!%p900_p5)
}
  0x4f   : > { %s904_s1 = scalar_lea.vmem %s1234_s23, 128  ;;  %s1074_s28 = smov [#allocation2]  }
  0x50   : > { %p905_p8 = scmp.ne.s32.totalorder %s1234_s23, %s904_s1  ;;  %s909_s8 = sshll.u32 %s1074_s28, 4  ;;  %s910_s8 = int_to_ptr.vmem [resolvable:$false] %s909_s8 }
  0x51   : > { %s911_s11 = scalar_lea.vmem %s910_s8, 256  ;;  %p912_p6 = scmp.lt.s32.totalorder %s1234_s23, %s910_s8 }
  0x52   : > { %p907_p9 = pnand %p905_p8, %p1194_p1  ;;  %p913_p11 = scmp.lt.s32.totalorder %s911_s11, %s904_s1 }
  0x54   : > { %p908_p3 = pneg %p907_p9  ;;  %p914_p10 = por %p913_p11, %p912_p6 }
  0x56   : > { %p915_p12 = pnand %p914_p10, %p908_p3 }
  0x58   : > { %918 = shalt.err (!%p915_p12)
}
  0x59   : > { %s1441_s22 = smov 4   ;;  %s1442_s6 = smov 64  }
  0x5a   : > { %766 = dma.hbm_to_vmem [thread:$0]  (!%p1174_p13), %s1232_s7, 128, %s1234_s23, %s191_s13, %s1442_s6, %s1442_s6, %s1441_s22  }
  0x5b   : > { %s1269_s1 = scalar_lea.hbm %s1419_s2, %s701_s10  ;;  %s237_s28 = scalar_lea.vmem [#allocation7], %s1172_s30 }
  0x5c   : > { %s244_s8 = sshll.u32 %s237_s28, 4  ;;  %s919_s11 = scalar_lea.hbm %s1269_s1, 16  ;;  %s245_s8 = int_to_ptr.vmem [resolvable:$true] %s244_s8 }
  0x5d   : > { %p920_p11 = scmp.ne.s32.totalorder %s1269_s1, %s919_s11  ;;  %s924_s7 = scalar_lea.hbm %s1419_s2, 48 }
  0x5e   : > { %p925_p2 = scmp.lt.u32.totalorder %s1269_s1, %s1419_s2  ;;  %p926_p4 = scmp.lt.u32.totalorder %s924_s7, %s919_s11 }
  0x5f   : > { %p922_p7 = pnand %p920_p11, %p1194_p1  ;;  %p928_p8 = scmp.lt.u32.totalorder %s919_s11, %s1269_s1 }
  0x60   : > { %p927_p5 = por %p926_p4, %p925_p2 }
  0x61   : > { %p923_p0 = pneg %p922_p7 }
  0x62   : > { %p929_p9 = por %p928_p8, %p927_p5 }
  0x64   : > { %p930_p3 = pnand %p929_p9, %p923_p0 }
  0x66   : > { %933 = shalt.err (!%p930_p3)
}
  0x67   : > { %s934_s6 = scalar_lea.vmem %s245_s8, 16  ;;  %s1075_s12 = smov [#allocation7]  }
  0x68   : > { %p935_p6 = scmp.ne.s32.totalorder %s245_s8, %s934_s6  ;;  %s939_s25 = sshll.u32 %s1075_s12, 4  ;;  %s940_s25 = int_to_ptr.vmem [resolvable:$false] %s939_s25 }
  0x69   : > { %s941_s0 = scalar_lea.vmem %s940_s25, 32  ;;  %p942_p11 = scmp.lt.s32.totalorder %s245_s8, %s940_s25 }
  0x6a   : > { %p937_p10 = pnand %p935_p6, %p1194_p1  ;;  %p943_p7 = scmp.lt.s32.totalorder %s941_s0, %s934_s6 }
  0x6c   : > { %p938_p12 = pneg %p937_p10  ;;  %p944_p13 = por %p943_p7, %p942_p11 }
  0x6e   : > { %p945_p2 = pnand %p944_p13, %p938_p12 }
  0x70   : > { %948 = shalt.err (!%p945_p2)
}
  0x71   : > { %p1443_p4 = scmp.ne.s32.totalorder %s1436_s5, 0  ;;  %s1295_s23 = scalar_lea.hbm %s1420_s3, %s701_s10 }
  0x72   : > { %s254_s7 = scalar_lea.vmem [#allocation8], %s1172_s30  ;;  %s252_s22 = scalar_lea.sflag [#allocation9], %s1172_s30 }
  0x73   : > { %772 = dma.hbm_to_vmem [thread:$0]  (!%p1443_p4), %s1269_s1, 16, %s245_s8, %s1188_s14  }
  0x74   : > { %s261_s13 = sshll.u32 %s254_s7, 4  ;;  %s949_s6 = scalar_lea.hbm %s1295_s23, 16  ;;  %s262_s13 = int_to_ptr.vmem [resolvable:$true] %s261_s13 }
  0x75   : > { %p950_p13 = scmp.ne.s32.totalorder %s1295_s23, %s949_s6  ;;  %s954_s8 = scalar_lea.hbm %s1420_s3, 48 }
  0x76   : > { %p955_p8 = scmp.lt.u32.totalorder %s1295_s23, %s1420_s3  ;;  %p956_p9 = scmp.lt.u32.totalorder %s954_s8, %s949_s6 }
  0x77   : > { %p952_p0 = pnand %p950_p13, %p1194_p1  ;;  %p958_p6 = scmp.lt.u32.totalorder %s949_s6, %s1295_s23 }
  0x78   : > { %p957_p3 = por %p956_p9, %p955_p8 }
  0x79   : > { %p953_p5 = pneg %p952_p0 }
  0x7a   : > { %p959_p10 = por %p958_p6, %p957_p3 }
  0x7c   : > { %p960_p12 = pnand %p959_p10, %p953_p5 }
  0x7e   : > { %963 = shalt.err (!%p960_p12)
}
  0x7f   : > { %s964_s30 = scalar_lea.vmem %s262_s13, 16  ;;  %s1076_s25 = smov [#allocation8]  }
  0x80   : > { %p965_p11 = scmp.ne.s32.totalorder %s262_s13, %s964_s30  ;;  %s969_s0 = sshll.u32 %s1076_s25, 4  ;;  %s970_s0 = int_to_ptr.vmem [resolvable:$false] %s969_s0 }
  0x81   : > { %s971_s28 = scalar_lea.vmem %s970_s0, 32  ;;  %p972_p13 = scmp.lt.s32.totalorder %s262_s13, %s970_s0 }
  0x82   : > { %p967_p7 = pnand %p965_p11, %p1194_p1  ;;  %p973_p0 = scmp.lt.s32.totalorder %s971_s28, %s964_s30 }
  0x84   : > { %p968_p2 = pneg %p967_p7  ;;  %p974_p4 = por %p973_p0, %p972_p13 }
  0x86   : > { %p975_p8 = pnand %p974_p4, %p968_p2 }
  0x88   : > { %978 = shalt.err (!%p975_p8)
}
  0x89   : > { %p1444_p9 = scmp.ne.s32.totalorder %s1436_s5, 0  ;;  %p1445_p5 = scmp.ne.s32.totalorder %s1439_s9, 0 }
  0x8a   : > { %s1319_s24 = sand.u32 (!%p1445_p5), 1, %s1053_s16   ;;  %p1446_p1 = scmp.ne.s32.totalorder (!%p1445_p5), %s1432_s26, 0 }
  0x8b   : > { %775 = dma.hbm_to_vmem [thread:$0]  (!%p1444_p9), %s1295_s23, 16, %s262_s13, %s252_s22  }
  0x8c   : > { %270 = sbr.rel (%p1445_p5) target bundleno = 642 (0x282), region = 36  ;;  %s704_s11 = sshll.u32 (!%p1445_p5), %s1319_s24, 3 }
  0x8d   : > { %s273_s7 = scalar_lea.sflag (!%p1445_p5), [#allocation3], %s1319_s24  ;;  %s1323_s6 = scalar_lea.vmem (!%p1445_p5), [#allocation2], %s704_s11 }
  0x93   : > { %1032 = dma.done.wait (%p1446_p1), %s273_s7, 128  }
  0x94   : > { %1034 = vsyncadd (%p1446_p1), %s273_s7, 4294967168  ;;  %s281_s5 = sand.u32 1, %s1139_s21   ;;  %s705_s9 = sshll.u32 %s1319_s24, 6 }
  0x95   : > { %s282_s23 = scalar_lea.sflag [#allocation6], %s281_s5  ;;  %s1331_s13 = scalar_lea.vmem [#allocation5], %s705_s9 }
  0x96   : > { %1036 = dma.done.wait (%p1446_p1), %s282_s23, 1040  }
  0x97   : > { %1038 = vsyncadd (%p1446_p1), %s282_s23, 4294966256  ;;  %s293_s22 = scalar_lea.vmem [#allocation7], %s1319_s24  ;;  %s299_s14 = scalar_lea.sflag [#allocation9], %s1319_s24 }
  0x98   : > { %s301_s1 = scalar_lea.vmem [#allocation8], %s1319_s24 }
  0x99   : > { %1040 = dma.done.wait (%p1446_p1), %s299_s14, 16  }
  0x9a   : > { %1042 = vsyncadd (%p1446_p1), %s299_s14, 4294967280  ;;  %v1077_v0 = vmov 0.0   ;;  %vm1078_vm0 = vmmov 0   ;;  %v837_v1 = vld [vmem:[%s1331_s13] sm:$0xff]   ;;  %v838_v2 = vld [vmem:[%s1331_s13 + $0x8] sm:$0xff]   ;;  %s706_s21 = sshll.u32 %s1319_s24, 1 }
  0x9b   : > { %733 = vmatprep.subr.bf16.mxu0 %v1077_v0  ;;  %749 = vmatprep.mubr.msk.bf16.mxu0 %vm1078_vm0, %v1077_v0  ;;  %v839_v3 = vld [vmem:[%s1331_s13 + $0x10] sm:$0xff]   ;;  %v840_v4 = vld [vmem:[%s1331_s13 + $0x18] sm:$0xff]   ;;  %v841_v5 = vld [vmem:[%s1331_s13 + $0x20] sm:$0xff]   ;;  %s719_s26 = sshll.u32 %s1061_s18, 4  ;;  %s338_s8 = scalar_lea.vmem [#allocation10], %s706_s21 }
  0x9c   : > { %734 = vmatpush3.bf16.msra.mxu0 %v837_v1  ;;  %v842_v6 = vld [vmem:[%s1331_s13 + $0x28] sm:$0xff]   ;;  %v843_v7 = vld [vmem:[%s1331_s13 + $0x30] sm:$0xff]   ;;  %v844_v8 = vld [vmem:[%s1331_s13 + $0x38] sm:$0xff]   ;;  %s545_s12 = sshll.u32 %s338_s8, 4  ;;  %s1367_s25 = scalar_lea.hbm %s1421_s4, %s719_s26  ;;  %s1369_s12 = int_to_ptr.vmem [resolvable:$true] %s545_s12 }
  0x9d   : > { %735 = vmatprep.subr.bf16.mxu0 %v1077_v0  ;;  %v1353_v9 = vld [vmem:[%s1323_s6] sm:$0xff]   ;;  %s530_s0 = scalar_lea.sflag [#allocation4], %s1319_s24  ;;  %s979_s18 = scalar_lea.vmem %s1369_s12, 32 }
  0x9e   : > { %v707_v10 = vld [vmem:[%s293_s22] ss:$0 sm:$0xff]  ;;  %v511_v54 = vunpack.c.l.bf16 %v1353_v9  ;;  %v512_v57 = vunpack.c.h.bf16 %v1353_v9  ;;  %p980_p4 = scmp.ne.s32.totalorder %s1369_s12, %s979_s18  ;;  %p1447_p3 = scmp.ne.s32.totalorder %s1433_s27, 0 }
  0x9f   : > { %v717_v17 = vld [vmem:[%s301_s1] ss:$0 sm:$0xff]  ;;  %s1079_s28 = smov [#allocation10]  }
  0xa0   : > { %736 = vmatpush3.bf16.msra.mxu0 %v838_v2  ;;  %p981_p6 = pnand %p980_p4, %p1447_p3  ;;  %s983_s11 = sshll.u32 %s1079_s28, 4  ;;  %s984_s11 = int_to_ptr.vmem [resolvable:$false] %s983_s11 }
  0xa1   : > { %737 = vmatprep.subr.bf16.mxu0 %v1077_v0  ;;  %s985_s7 = scalar_lea.vmem %s984_s11, 64  ;;  %p986_p12 = scmp.lt.s32.totalorder %s1369_s12, %s984_s11 }
  0xa2   : > { %p982_p10 = pneg %p981_p6  ;;  %p987_p11 = scmp.lt.s32.totalorder %s985_s7, %s979_s18 }
  0xa4   : > { %738 = vmatpush3.bf16.msra.mxu0 %v839_v3  ;;  %p988_p7 = por %p987_p11, %p986_p12 }
  0xa5   : > { %739 = vmatprep.subr.bf16.mxu0 %v1077_v0 }
  0xa6   : > { %p989_p2 = pnand %p988_p7, %p982_p10 }
  0xa8   : > { %740 = vmatpush3.bf16.msra.mxu0 %v840_v4 }
  0xa9   : > { %741 = vmatprep.subr.bf16.mxu0 %v1077_v0 }
  0xac   : > { %742 = vmatpush3.bf16.msra.mxu0 %v841_v5 }
  0xad   : > { %743 = vmatprep.subr.bf16.mxu0 %v1077_v0 }
  0xb0   : > { %744 = vmatpush3.bf16.msra.mxu0 %v842_v6 }
  0xb1   : > { %745 = vmatprep.subr.bf16.mxu0 %v1077_v0 }
  0xb4   : > { %746 = vmatpush3.bf16.msra.mxu0 %v843_v7 }
  0xb5   : > { %747 = vmatprep.subr.bf16.mxu0 %v1077_v0 }
  0xb8   : > { %748 = vmatpush3.bf16.msra.mxu0 %v844_v8 }
  0xbb   : > { %750 = vmatmul.mubr.bf16.vlgmr.msra.gmra.mrb[0].mxu0 %v1353_v9 }
 0x18e   : > { %v456_v11 = vpop.f32.mrb[0].mxu0 }
 0x18f   : > { %v457_v12 = vadd.f32 %v707_v10, %v456_v11  ;;  %v751_v13 = vpop.f32.mrb[1].mxu0 }
 0x190   : > { %v459_v14 = vpop.f32.mrb[2].mxu0 }
 0x191   : > { %847 = vtanh.f32 %v457_v12  ;;  %v460_v15 = vadd.f32 %v707_v10, %v459_v14  ;;  %v752_v16 = vpop.f32.mrb[3].mxu0 }
 0x193   : > { %849 = vtanh.f32 %v460_v15 }
 0x19b   : > { %v848_v18 = vpop.eup %847 }
 0x19c   : > { %v471_v19 = vmul.f32 %v848_v18, %v717_v17 }
 0x19d   : > { %v850_v20 = vpop.eup %849 }
 0x19e   : > { %473 = vadd.xlane.f32.xlu0 %v471_v19  ;;  %v472_v21 = vmul.f32 %v850_v20, %v717_v17 }
 0x1a2   : > { %475 = vadd.xlane.f32.xlu0 %v472_v21 }
 0x22b   : > { %v474_v22 = vpop.xlane.xlu0 %473 }
 0x22c   : > { %v477_v23 = vrot.slane %v474_v22, 4 }
 0x22e   : > { %v478_v24 = vmax.f32 %v474_v22, %v477_v23 }
 0x22f   : > { %v476_v25 = vpop.xlane.xlu0 %475 }
 0x230   : > { %v479_v26 = vrot.slane %v478_v24, 2  ;;  %v483_v27 = vrot.slane %v476_v25, 4 }
 0x232   : > { %v480_v28 = vmax.f32 %v478_v24, %v479_v26  ;;  %v484_v29 = vmax.f32 %v476_v25, %v483_v27 }
 0x234   : > { %v481_v30 = vrot.slane %v480_v28, 1  ;;  %v485_v31 = vrot.slane %v484_v29, 2 }
 0x236   : > { %v482_v32 = vmax.f32 %v480_v28, %v481_v30  ;;  %v486_v33 = vmax.f32 %v484_v29, %v485_v31 }
 0x238   : > { %v489_v34 = vsub.f32 %v474_v22, %v482_v32  ;;  %v487_v35 = vrot.slane %v486_v33, 1 }
 0x23a   : > { %v491_v36 = vmul.f32 1.442695, %v489_v34  ;;  %v488_v37 = vmax.f32 %v486_v33, %v487_v35 }
 0x23c   : > { %851 = vpow2.f32 %v491_v36  ;;  %v490_v38 = vsub.f32 %v476_v25, %v488_v37 }
 0x23e   : > { %v493_v39 = vmul.f32 1.442695, %v490_v38 }
 0x240   : > { %853 = vpow2.f32 %v493_v39 }
 0x246   : > { %v852_v40 = vpop.eup %851 }
 0x247   : > { %v495_v41 = vrot.slane %v852_v40, 4 }
 0x249   : > { %v496_v42 = vadd.f32 %v852_v40, %v495_v41 }
 0x24a   : > { %v854_v43 = vpop.eup %853 }
 0x24b   : > { %v497_v44 = vrot.slane %v496_v42, 2  ;;  %v501_v45 = vrot.slane %v854_v43, 4 }
 0x24d   : > { %v498_v46 = vadd.f32 %v497_v44, %v496_v42  ;;  %v502_v47 = vadd.f32 %v854_v43, %v501_v45 }
 0x24f   : > { %v499_v48 = vrot.slane %v498_v46, 1  ;;  %v503_v49 = vrot.slane %v502_v47, 2 }
 0x251   : > { %v500_v50 = vadd.f32 %v499_v48, %v498_v46  ;;  %v504_v51 = vadd.f32 %v503_v49, %v502_v47 }
 0x253   : > { %855 = vrcp.f32 %v500_v50  ;;  %v505_v52 = vrot.slane %v504_v51, 1 }
 0x255   : > { %v506_v53 = vadd.f32 %v505_v52, %v504_v51 }
 0x257   : > { %857 = vrcp.f32 %v506_v53 }
 0x25d   : > { %v856_v55 = vpop.eup %855 }
 0x25e   : > { %v509_v56 = vmul.f32 %v856_v55, %v852_v40 }
 0x260   : > { %v513_v58 = vmul.f32 %v511_v54, %v509_v56 }
 0x261   : > { %v858_v59 = vpop.eup %857 }
 0x262   : > { %v510_v60 = vmul.f32 %v858_v59, %v854_v43  ;;  %v515_v61 = vrot.slane %v513_v58, 4 }
 0x264   : > { %v514_v62 = vmul.f32 %v512_v57, %v510_v60  ;;  %v516_v63 = vadd.f32 %v515_v61, %v513_v58 }
 0x266   : > { %v517_v0 = vrot.slane %v516_v63, 2  ;;  %v521_v1 = vrot.slane %v514_v62, 4 }
 0x268   : > { %v518_v2 = vadd.f32 %v517_v0, %v516_v63  ;;  %v522_v3 = vadd.f32 %v521_v1, %v514_v62 }
 0x26a   : > { %v519_v4 = vrot.slane %v518_v2, 1  ;;  %v523_v5 = vrot.slane %v522_v3, 2 }
 0x26c   : > { %v520_v6 = vadd.f32 %v519_v4, %v518_v2  ;;  %v524_v7 = vadd.f32 %v523_v5, %v522_v3 }
 0x26e   : > { %v525_v8 = vrot.slane %v524_v7, 1  ;;  %527 = vst [vmem:[%s338_s8] sm:$0x1] %v520_v6 }
 0x270   : > { %v526_v9 = vadd.f32 %v525_v8, %v524_v7 }
 0x272   : > { %528 = vst [vmem:[%s338_s8 + $0x1] sm:$0x1] %v526_v9 }
 0x273   : > { %992 = shalt.err (!%p989_p2)
}
 0x274   : > { %s993_s6 = scalar_lea.hbm %s1367_s25, 32  ;;  %s997_s23 = scalar_lea.hbm %s1421_s4, 96 }
 0x275   : > { %p994_p13 = scmp.ne.s32.totalorder %s1367_s25, %s993_s6  ;;  %p998_p9 = scmp.lt.u32.totalorder %s1367_s25, %s1421_s4 }
 0x276   : > { %p999_p5 = scmp.lt.u32.totalorder %s997_s23, %s993_s6  ;;  %p1001_p4 = scmp.lt.u32.totalorder %s993_s6, %s1367_s25 }
 0x277   : > { %p995_p0 = pnand %p994_p13, %p1447_p3 }
 0x278   : > { %p1000_p1 = por %p999_p5, %p998_p9 }
 0x279   : > { %p996_p8 = pneg %p995_p0 }
 0x27a   : > { %p1002_p6 = por %p1001_p4, %p1000_p1 }
 0x27c   : > { %p1003_p10 = pnand %p1002_p6, %p996_p8 }
 0x27e   : > { %1006 = shalt.err (!%p1003_p10)
}
 0x27f   : > { %s1080_s14 = smov 16   ;;  %s1081_s1 = smov 48  }
 0x280   : > { %s1082_s21 = smov 1  }
 0x281   : > { %761 = dma.vmem_to_hbm [thread:$0]  (%p1447_p3), %s1369_s12, 32, %s1367_s25, %s530_s0, %s1080_s14, %s1081_s1, %s1082_s21  }
 0x282 PF: > { %p781_p12 = scmp.ge.s32.totalorder %s1069_s20, 2  ;;  %s560_s26 = sand.u32 1, %s1049_s15  }
 0x283   : > { %p1448_p11 = scmp.ne.s32.totalorder %s1435_s29, 0  ;;  %s561_s8 = scalar_lea.sflag [#allocation4], %s560_s26 }
 0x285   : > { %p777_p7 = pnand %p781_p12, %p1448_p11 }
 0x287   : > { %1044 = dma.done.wait (!%p777_p7), %s561_s8, 32  }
 0x288   : > { %1046 = vsyncadd (!%p777_p7), %s561_s8, 4294967264  ;;  %s26_s20 = sadd.s32 1, %s1069_s20   ;;  %s1449_s10 = sld [smem:[#allocation16_spill]] }
 0x289   : > { %p23_p2 = scmp.ge.s32.totalorder %s26_s20, 5   ;;  %s1450_s27 = sld [smem:[#allocation15_spill]] }
 0x28a   : > { %s1451_s15 = smov %s1053_s16  ;;  %s1452_s16 = smov %s1057_s17 }
 0x28b   : > { %s1454_s18 = smov %s1065_s19  ;;  %25 = sbr.rel (!%p23_p2) target bundleno = 13 (0xd), region = 118 }
 0x28e   : > { %s1453_s17 = smov %s1449_s10 }
 0x28f   : > { %s1455_s19 = smov %s1450_s27 }
 0x292   :  { %566 = vsyncpa [#allocation3], 1 }
 0x293   :  { %568 = vsyncpa [#allocation3 + $0x1], 1 }
 0x294   :  { %569 = vsyncpa [#allocation6], 1 }
 0x295   :  { %571 = vsyncpa [#allocation6 + $0x1], 1 }
 0x296   :  { %572 = vsyncpa [#allocation9], 1 }
 0x297   :  { %574 = vsyncpa [#allocation9 + $0x1], 1 }
 0x298   :  { %575 = vsyncpa [#allocation4], 1 }
 0x299   :  { %577 = vsyncpa [#allocation4 + $0x1], 1 }

</bundles_post_ra>
